<compile_context>
chip_gen: v7x
topology: tpu7x:2x2x1
jax: 0.10.0
libtpu: 0.0.40
codegen_flags: <defaults>
</compile_context>

<pallas_src>
import math

import jax
import jax.numpy as jnp
from jax.experimental import pallas as pl
from jax.experimental.pallas import tpu as pltpu


def _round_up(x, m):
    return (x + m - 1) // m * m


def _use_merged_k(half):
    """True if one K=2*half matmul should be used (256-deep MXU: v6e/v7x)."""
    if half % 128 != 0:
        return False          # keep fully aligned slice-stores into the scratch
    try:
        kind = jax.devices()[0].device_kind.lower()
    except Exception:
        return True
    for old in ("v2", "v3", "v4", "v5"):
        if old in kind:       # 128-deep MXU: split-K=128 already full depth
            return False
    return True


def _choose_tile(n, tile_m):
    """Row tile: multiple of 8, chosen to minimize padding waste."""
    n8 = _round_up(max(n, 1), 8)
    if n8 <= tile_m:
        return n8
    n_tiles = math.ceil(n / tile_m)
    return _round_up(math.ceil(n / n_tiles), 8)


# --------------------------------------------------------------------------
# Kernels
# --------------------------------------------------------------------------

def timestep_embedder_kernel_split(t_ref, freqs_ref, w1c_ref, w1s_ref, b1_ref,
                                   w2_ref, b2_ref, out_ref):
    # v5e path: two K=half dots against pre-split W1 halves (full MXU depth).
    t = t_ref[...]                                   # (TM, 1) f32
    args = t * freqs_ref[...]                        # (TM, half) outer product

    cdt = w1c_ref.dtype
    h = jnp.dot(jnp.cos(args).astype(cdt), w1c_ref[...],
                preferred_element_type=jnp.float32)
    h = h + jnp.dot(jnp.sin(args).astype(cdt), w1s_ref[...],
                    preferred_element_type=jnp.float32)
    h = h + b1_ref[...]                              # bias in f32
    h = h * jax.nn.sigmoid(h)                        # SiLU in f32 (EUP)

    out = jnp.dot(h.astype(w2_ref.dtype), w2_ref[...],
                  preferred_element_type=jnp.float32)
    out_ref[...] = (out + b2_ref[...]).astype(out_ref.dtype)


def timestep_embedder_kernel_merged(t_ref, freqs_ref, w1_ref, b1_ref,
                                    w2_ref, b2_ref, out_ref, emb_ref):
    # v6e/v7x path: write cos|sin into a (TM, 2*half) VMEM scratch and issue a
    # single K=2*half matmul, keeping the 256-deep systolic array full.
    half = freqs_ref.shape[1]
    t = t_ref[...]                                   # (TM, 1) f32
    args = t * freqs_ref[...]                        # (TM, half)

    cdt = emb_ref.dtype
    emb_ref[:, :half] = jnp.cos(args).astype(cdt)
    emb_ref[:, half:] = jnp.sin(args).astype(cdt)

    h = jnp.dot(emb_ref[...], w1_ref[...], preferred_element_type=jnp.float32)
    h = h + b1_ref[...]
    h = h * jax.nn.sigmoid(h)

    out = jnp.dot(h.astype(w2_ref.dtype), w2_ref[...],
                  preferred_element_type=jnp.float32)
    out_ref[...] = (out + b2_ref[...]).astype(out_ref.dtype)


# --------------------------------------------------------------------------
# Parameter preparation (done once, outside the hot path)
# --------------------------------------------------------------------------

def prepare_params(params, frequency_embedding_size=256, max_period=10000,
                   compute_dtype=jnp.bfloat16, merged=None):
    """Pad / cast / split the MLP parameters once.

    params = (w1, b1, w2, b2) with w1: (freq_dim, H), w2: (H, H) already
    transposed relative to torch Linear.weight, so the kernel does x @ W.
    """
    w1, b1, w2, b2 = params
    hidden = w1.shape[1]
    half = frequency_embedding_size // 2
    if merged is None:
        merged = _use_merged_k(half)

    # Lane-dense padded hidden dim -> unmasked vector stores, MXU-friendly N.
    h_pad = max(128, _round_up(hidden, 128))

    freqs = jnp.exp(
        -math.log(max_period) * jnp.arange(half, dtype=jnp.float32) / half)
    freqs2d = freqs.reshape(1, half)

    def pad_cols(x, cols):
        return jnp.pad(x, ((0, 0), (0, cols - x.shape[-1])))

    # If frequency_embedding_size is odd the reference appends a zero column to
    # the embedding; that column multiplies the last W1 row by zero, so using
    # only rows [0, 2*half) of W1 is equivalent.
    if merged:
        w1_parts = (pad_cols(w1[:2 * half], h_pad).astype(compute_dtype),)
    else:
        w1_parts = (pad_cols(w1[:half], h_pad).astype(compute_dtype),
                    pad_cols(w1[half:2 * half], h_pad).astype(compute_dtype))

    b1p = pad_cols(b1.reshape(1, hidden).astype(jnp.float32), h_pad)
    w2p = jnp.pad(w2, ((0, h_pad - hidden), (0, h_pad - hidden))
                  ).astype(compute_dtype)
    b2p = pad_cols(b2.reshape(1, hidden).astype(jnp.float32), h_pad)

    return dict(merged=merged, half=half, hidden=hidden, h_pad=h_pad,
                compute_dtype=compute_dtype, freqs=freqs2d, w1=w1_parts,
                b1=b1p, w2=w2p, b2=b2p)


# --------------------------------------------------------------------------
# Hot-path wrapper
# --------------------------------------------------------------------------

def timestep_embedder(t, prepared, tile_m=512, out_dtype=jnp.float32):
    """t: (N,) float array of timesteps. Returns (N, hidden_size) out_dtype."""
    merged = prepared["merged"]
    half = prepared["half"]
    hidden = prepared["hidden"]
    h_pad = prepared["h_pad"]
    cdt = prepared["compute_dtype"]
    freqs2d = prepared["freqs"]
    b1p, w2p, b2p = prepared["b1"], prepared["w2"], prepared["b2"]

    n = t.shape[0]
    tm = _choose_tile(n, tile_m)
    n_pad = _round_up(n, tm)
    grid = (n_pad // tm,)

    t2d = jnp.pad(t.astype(jnp.float32).reshape(n, 1), ((0, n_pad - n), (0, 0)))

    # Constant blocks: same block every grid step, single-buffered (no dead
    # 2x VMEM copy of the weights).
    def const(shape):
        return pl.BlockSpec(shape, lambda i: (0, 0),
                            pipeline_mode=pl.Buffered(1))

    if merged:
        (w1p,) = prepared["w1"]
        kernel = timestep_embedder_kernel_merged
        weight_specs = [const(w1p.shape)]
        weight_args = [w1p]
        scratch = [pltpu.VMEM((tm, 2 * half), cdt)]
        w1_elems = w1p.size
    else:
        w1c, w1s = prepared["w1"]
        kernel = timestep_embedder_kernel_split
        weight_specs = [const(w1c.shape), const(w1s.shape)]
        weight_args = [w1c, w1s]
        scratch = []
        w1_elems = w1c.size + w1s.size

    itemsize = jnp.dtype(cdt).itemsize
    out_itemsize = jnp.dtype(out_dtype).itemsize

    # VMEM budget: constants x 1 buffer, t/out tiles x 2 buffers, + scratch.
    const_bytes = (freqs2d.size * 4 + w1_elems * itemsize
                   + b1p.size * 4 + w2p.size * itemsize + b2p.size * 4)
    stream_bytes = 2 * (tm * 1 * 4) + 2 * (tm * h_pad * out_itemsize)
    scratch_bytes = (tm * 2 * half * itemsize) if merged else 0
    vmem_limit = int((const_bytes + stream_bytes + scratch_bytes) * 3 // 2) + (1 << 20)
    vmem_limit = int(min(max(vmem_limit, 4 << 20), 100 << 20))

    cost = pl.CostEstimate(
        flops=int(2 * n_pad * (2 * half * h_pad + h_pad * h_pad)),
        transcendentals=int(n_pad * (2 * half + h_pad)),   # cos, sin, sigmoid
        bytes_accessed=int(t2d.size * 4 + const_bytes + n_pad * h_pad * out_itemsize),
    )

    out = pl.pallas_call(
        kernel,
        out_shape=jax.ShapeDtypeStruct((n_pad, h_pad), out_dtype),
        grid=grid,
        in_specs=[
            pl.BlockSpec((tm, 1), lambda i: (i, 0)),    # streamed t rows
            const(freqs2d.shape),
            *weight_specs,
            const(b1p.shape),
            const(w2p.shape),
            const(b2p.shape),
        ],
        out_specs=pl.BlockSpec((tm, h_pad), lambda i: (i, 0)),
        scratch_shapes=scratch,
        compiler_params=pltpu.CompilerParams(
            dimension_semantics=("parallel",),            # 2-TC sharding on v7x
            vmem_limit_bytes=vmem_limit),
        cost_estimate=cost,
    )(t2d, freqs2d, *weight_args, b1p, w2p, b2p)

    return out[:n, :hidden]


# --------------------------------------------------------------------------
# Init + pure-JAX reference
# --------------------------------------------------------------------------

def init_params(key, hidden_size, frequency_embedding_size=256):
    """Deterministic init mimicking torch.nn.Linear default (uniform +-1/sqrt(fan_in))."""
    k1, k2, k3, k4 = jax.random.split(key, 4)
    bound1 = 1.0 / math.sqrt(frequency_embedding_size)
    bound2 = 1.0 / math.sqrt(hidden_size)
    # Stored already transposed: (in_features, out_features) so kernel does x @ W.
    w1 = jax.random.uniform(k1, (frequency_embedding_size, hidden_size),
                            jnp.float32, -bound1, bound1)
    b1 = jax.random.uniform(k2, (hidden_size,), jnp.float32, -bound1, bound1)
    w2 = jax.random.uniform(k3, (hidden_size, hidden_size),
                            jnp.float32, -bound2, bound2)
    b2 = jax.random.uniform(k4, (hidden_size,), jnp.float32, -bound2, bound2)
    return w1, b1, w2, b2


def timestep_embedder_ref(t, params, frequency_embedding_size=256,
                          max_period=10000):
    """Pure-JAX reference mirroring the PyTorch forward (f32 throughout)."""
    w1, b1, w2, b2 = params
    half = frequency_embedding_size // 2
    freqs = jnp.exp(
        -math.log(max_period) * jnp.arange(half, dtype=jnp.float32) / half)
    args = t.astype(jnp.float32)[:, None] * freqs[None]
    emb = jnp.concatenate([jnp.cos(args), jnp.sin(args)], axis=-1)
    h = emb @ w1 + b1
    h = h * jax.nn.sigmoid(h)
    return h @ w2 + b2


if __name__ == "__main__":
    key = jax.random.PRNGKey(0)
    k_t, k_p, k_t2 = jax.random.split(key, 3)

    N = 8                # batch of timesteps
    HIDDEN = 32          # hidden_size
    FREQ = 256           # frequency_embedding_size

    # Fractional timesteps in [0, 1000), deterministic.
    t = jax.random.uniform(k_t, (N,), jnp.float32, 0.0, 1000.0)
    params = init_params(k_p, HIDDEN, FREQ)
    ref = timestep_embedder_ref(t, params, frequency_embedding_size=FREQ)

    # Parameter padding / casting / splitting hoisted out of the hot path.
    prep_f32 = prepare_params(params, FREQ, compute_dtype=jnp.float32)
    prep_bf16 = prepare_params(params, FREQ, compute_dtype=jnp.bfloat16)

    # 1) f32 compute path: tight-tolerance structural check.
    out_f32 = jax.block_until_ready(timestep_embedder(t, prep_f32))
    assert out_f32.shape == (N, HIDDEN), out_f32.shape
    assert jnp.allclose(out_f32, ref, atol=1e-4, rtol=1e-4), \
        f"f32 max abs diff {jnp.max(jnp.abs(out_f32 - ref))}"

    # 2) Default bf16-MXU path: looser tolerance (f32 accumulation retained).
    out_bf16 = jax.block_until_ready(timestep_embedder(t, prep_bf16))
    assert out_bf16.shape == (N, HIDDEN), out_bf16.shape
    assert jnp.allclose(out_bf16, ref, atol=1e-1, rtol=1e-1), \
        f"bf16 max abs diff {jnp.max(jnp.abs(out_bf16 - ref))}"

    # 3) Multi-tile grid path: N not a multiple of the row tile (exercises the
    #    adaptive tile selection + parallel grid).
    N2 = 300
    t2 = jax.random.uniform(k_t2, (N2,), jnp.float32, 0.0, 1000.0)
    out2 = jax.block_until_ready(timestep_embedder(t2, prep_bf16, tile_m=128))
    ref2 = timestep_embedder_ref(t2, params, frequency_embedding_size=FREQ)
    assert out2.shape == (N2, HIDDEN), out2.shape
    assert jnp.allclose(out2, ref2, atol=1e-1, rtol=1e-1), \
        f"grid max abs diff {jnp.max(jnp.abs(out2 - ref2))}"

    # 4) Explicitly exercise the split-K (v5e-style) code path regardless of
    #    the chip this runs on.
    prep_split = prepare_params(params, FREQ, compute_dtype=jnp.bfloat16,
                                merged=False)
    out_split = jax.block_until_ready(timestep_embedder(t, prep_split))
    assert out_split.shape == (N, HIDDEN), out_split.shape
    assert jnp.allclose(out_split, ref, atol=1e-1, rtol=1e-1), \
        f"split-K max abs diff {jnp.max(jnp.abs(out_split - ref))}"

    print("KERNEL_OK")
</pallas_src>

<mosaic_0001>
module attributes {stable_mosaic.version = 11 : i64} {
  func.func @timestep_embedder_kernel_merged(%arg0: i32, %arg1: memref<8x1xf32, #tpu.memory_space<vmem>>, %arg2: memref<1x128xf32, #tpu.memory_space<vmem>>, %arg3: memref<256x128xf32, #tpu.memory_space<vmem>>, %arg4: memref<1x128xf32, #tpu.memory_space<vmem>>, %arg5: memref<128x128xf32, #tpu.memory_space<vmem>>, %arg6: memref<1x128xf32, #tpu.memory_space<vmem>>, %arg7: memref<8x128xf32, #tpu.memory_space<vmem>>, %arg8: memref<8x256xf32, #tpu.memory_space<vmem>>) attributes {dimension_semantics = [#tpu.dimension_semantics<parallel>], iteration_bounds = array<i64: 1>, scalar_prefetch = 0 : i64, scratch_operands = 1 : i64, tpu.core_type = #tpu.core_type<tc>, window_params = [{transform_indices = @transform_0, window_bounds = array<i64: 8, 1>}, {pipeline_mode = #tpu.pipeline_mode<synchronous>, transform_indices = @transform_1, window_bounds = array<i64: 1, 128>}, {pipeline_mode = #tpu.pipeline_mode<synchronous>, transform_indices = @transform_2, window_bounds = array<i64: 256, 128>}, {pipeline_mode = #tpu.pipeline_mode<synchronous>, transform_indices = @transform_3, window_bounds = array<i64: 1, 128>}, {pipeline_mode = #tpu.pipeline_mode<synchronous>, transform_indices = @transform_4, window_bounds = array<i64: 128, 128>}, {pipeline_mode = #tpu.pipeline_mode<synchronous>, transform_indices = @transform_5, window_bounds = array<i64: 1, 128>}, {transform_indices = @transform_6, window_bounds = array<i64: 8, 128>}]} {
    %c0 = arith.constant 0 : index
    %c0_0 = arith.constant 0 : index
    %0 = vector.load %arg1[%c0, %c0_0] : memref<8x1xf32, #tpu.memory_space<vmem>>, vector<8x1xf32>
    %c0_1 = arith.constant 0 : index
    %c0_2 = arith.constant 0 : index
    %1 = vector.load %arg2[%c0_1, %c0_2] : memref<1x128xf32, #tpu.memory_space<vmem>>, vector<1x128xf32>
    %2 = vector.broadcast %0 : vector<8x1xf32> to vector<8x128xf32>
    %3 = vector.broadcast %1 : vector<1x128xf32> to vector<8x128xf32>
    %4 = arith.mulf %2, %3 : vector<8x128xf32>
    %5 = math.cos %4 : vector<8x128xf32>
    %c0_3 = arith.constant 0 : index
    %c0_4 = arith.constant 0 : index
    %6 = vector.load %arg8[%c0_3, %c0_4] : memref<8x256xf32, #tpu.memory_space<vmem>>, vector<8x128xf32>
    tpu.vector_store %arg8[%c0_3, %c0_4], %5 {strides = array<i32>} : memref<8x256xf32, #tpu.memory_space<vmem>>, vector<8x128xf32>,
    %7 = math.sin %4 : vector<8x128xf32>
    %c0_5 = arith.constant 0 : index
    %c128 = arith.constant 128 : index
    %8 = vector.load %arg8[%c0_5, %c128] : memref<8x256xf32, #tpu.memory_space<vmem>>, vector<8x128xf32>
    tpu.vector_store %arg8[%c0_5, %c128], %7 {strides = array<i32>} : memref<8x256xf32, #tpu.memory_space<vmem>>, vector<8x128xf32>,
    %c0_6 = arith.constant 0 : index
    %c0_7 = arith.constant 0 : index
    %9 = vector.load %arg8[%c0_6, %c0_7] : memref<8x256xf32, #tpu.memory_space<vmem>>, vector<8x256xf32>
    %c0_8 = arith.constant 0 : index
    %c0_9 = arith.constant 0 : index
    %10 = vector.load %arg3[%c0_8, %c0_9] : memref<256x128xf32, #tpu.memory_space<vmem>>, vector<256x128xf32>
    %cst = arith.constant dense<0.000000e+00> : vector<8x128xf32>
    %11 = tpu.matmul %9, %10, %cst {dimension_numbers = #tpu.dot_dimension_numbers<[1], [0], [0], [1], [0, 0, 1, 1], [], []>} : vector<8x256xf32>, vector<256x128xf32>, vector<8x128xf32> -> vector<8x128xf32>
    %c0_10 = arith.constant 0 : index
    %c0_11 = arith.constant 0 : index
    %12 = vector.load %arg4[%c0_10, %c0_11] : memref<1x128xf32, #tpu.memory_space<vmem>>, vector<1x128xf32>
    %13 = vector.broadcast %12 : vector<1x128xf32> to vector<8x128xf32>
    %14 = arith.addf %11, %13 : vector<8x128xf32>
    %15 = arith.negf %14 : vector<8x128xf32>
    %16 = math.exp %15 : vector<8x128xf32>
    %cst_12 = arith.constant 1.000000e+00 : f32
    %17 = vector.broadcast %cst_12 : f32 to vector<8x128xf32>
    %18 = arith.addf %17, %16 : vector<8x128xf32>
    %19 = arith.divf %17, %18 : vector<8x128xf32>
    %20 = arith.mulf %14, %19 : vector<8x128xf32>
    %c0_13 = arith.constant 0 : index
    %c0_14 = arith.constant 0 : index
    %21 = vector.load %arg5[%c0_13, %c0_14] : memref<128x128xf32, #tpu.memory_space<vmem>>, vector<128x128xf32>
    %cst_15 = arith.constant dense<0.000000e+00> : vector<8x128xf32>
    %22 = tpu.matmul %20, %21, %cst_15 {dimension_numbers = #tpu.dot_dimension_numbers<[1], [0], [0], [1], [0, 0, 1, 1], [], []>} : vector<8x128xf32>, vector<128x128xf32>, vector<8x128xf32> -> vector<8x128xf32>
    %c0_16 = arith.constant 0 : index
    %c0_17 = arith.constant 0 : index
    %23 = vector.load %arg6[%c0_16, %c0_17] : memref<1x128xf32, #tpu.memory_space<vmem>>, vector<1x128xf32>
    %24 = vector.broadcast %23 : vector<1x128xf32> to vector<8x128xf32>
    %25 = arith.addf %22, %24 : vector<8x128xf32>
    %c0_18 = arith.constant 0 : index
    %c0_19 = arith.constant 0 : index
    %26 = vector.load %arg7[%c0_18, %c0_19] : memref<8x128xf32, #tpu.memory_space<vmem>>, vector<8x128xf32>
    tpu.vector_store %arg7[%c0_18, %c0_19], %25 {strides = array<i32>} : memref<8x128xf32, #tpu.memory_space<vmem>>, vector<8x128xf32>,
    return
  }
  func.func @transform_0(%arg0: i32) -> (i32, i32) {
    %c0_i32 = arith.constant 0 : i32
    %c0_i32_0 = arith.constant 0 : i32
    return %arg0, %c0_i32 : i32, i32
  }
  func.func @transform_1(%arg0: i32) -> (i32, i32) {
    %c0_i32 = arith.constant 0 : i32
    %c0_i32_0 = arith.constant 0 : i32
    %c0_i32_1 = arith.constant 0 : i32
    return %c0_i32, %c0_i32_0 : i32, i32
  }
  func.func @transform_2(%arg0: i32) -> (i32, i32) {
    %c0_i32 = arith.constant 0 : i32
    %c0_i32_0 = arith.constant 0 : i32
    %c0_i32_1 = arith.constant 0 : i32
    return %c0_i32, %c0_i32_0 : i32, i32
  }
  func.func @transform_3(%arg0: i32) -> (i32, i32) {
    %c0_i32 = arith.constant 0 : i32
    %c0_i32_0 = arith.constant 0 : i32
    %c0_i32_1 = arith.constant 0 : i32
    return %c0_i32, %c0_i32_0 : i32, i32
  }
  func.func @transform_4(%arg0: i32) -> (i32, i32) {
    %c0_i32 = arith.constant 0 : i32
    %c0_i32_0 = arith.constant 0 : i32
    %c0_i32_1 = arith.constant 0 : i32
    return %c0_i32, %c0_i32_0 : i32, i32
  }
  func.func @transform_5(%arg0: i32) -> (i32, i32) {
    %c0_i32 = arith.constant 0 : i32
    %c0_i32_0 = arith.constant 0 : i32
    %c0_i32_1 = arith.constant 0 : i32
    return %c0_i32, %c0_i32_0 : i32, i32
  }
  func.func @transform_6(%arg0: i32) -> (i32, i32) {
    %c0_i32 = arith.constant 0 : i32
    %c0_i32_0 = arith.constant 0 : i32
    return %arg0, %c0_i32 : i32, i32
  }
}

</mosaic_0001>

<bundles_post_ra>
// kernel: tpu_custom_call.1
= control target key start
LH: loop header
LB: loop body
LE: loop exit
PB: predicated region body
PF: predicated region fallthrough
CT: control target
= control target key end

     0   :  { %11 = vsyncpa [#allocation4], 0  ;;  %s877_s0 = inlined_call_operand.vmem [shape: f32[8,1], index: 0, kind: input, shape index: {}]   ;;  %s878_s1 = inlined_call_operand.vmem [shape: f32[1,128], index: 1, kind: input, shape index: {}]   ;;  %s879_s2 = inlined_call_operand.hbm [shape: f32[256,128], index: 2, kind: input, shape index: {}]   ;;  %s880_s3 = inlined_call_operand.vmem [shape: f32[1,128], index: 3, kind: input, shape index: {}]   ;;  %s881_s4 = inlined_call_operand.hbm [shape: f32[128,128], index: 4, kind: input, shape index: {}]   ;;  %s882_s5 = inlined_call_operand.vmem [shape: f32[1,128], index: 5, kind: input, shape index: {}]   ;;  %s883_s6 = inlined_call_operand.hbm [shape: f32[8,128], index: 6, kind: output, shape index: {}]  }
   0x1   :  { %12 = vsyncpa [#allocation7], 0 }
   0x2   :  { %13 = vsyncpa [#allocation5], 0  ;;  %s758_s21 = smov [#allocation3]   ;;  %s686_s25 = scalar_lea.hbm %s879_s2, 4096 }
   0x3   :  { %s23_s22 = sshll.u32 %s758_s21, 4  ;;  %p687_p0 = scmp.ne.s32.totalorder %s879_s2, %s686_s25  ;;  %s24_s22 = int_to_ptr.vmem [resolvable:$true] %s23_s22 }
   0x4   :  { %p690_p1 = scmp.lt.u32.totalorder %s686_s25, %s879_s2 }
   0x6   :  { %p692_p2 = pnand %p690_p1, %p687_p0 }
   0x8   :  { %695 = shalt.err (!%p692_p2)
}
   0x9   :  { %s696_s30 = scalar_lea.vmem %s24_s22, 4096  ;;  %p701_p4 = scmp.lt.s32.totalorder %s24_s22, %s24_s22 }
   0xa   :  { %p697_p3 = scmp.ne.s32.totalorder %s24_s22, %s696_s30  ;;  %p702_p5 = scmp.lt.s32.totalorder %s696_s30, %s696_s30 }
   0xc   :  { %p703_p6 = por %p702_p5, %p701_p4 }
   0xe   :  { %p704_p7 = pnand %p703_p6, %p697_p3 }
  0x10   :  { %707 = shalt.err (!%p704_p7)
}
  0x11   :  { %s759_s7 = smov 128   ;;  %s760_s8 = smov 8  }
  0x12   :  { %29 = dma.hbm_to_vmem [thread:$0]  %s879_s2, 4096, %s24_s22, [#allocation4], %s759_s7, %s759_s7, %s760_s8  }
  0x13   :  { %s761_s11 = smov [#allocation6]   ;;  %s708_s15 = scalar_lea.hbm %s881_s4, 2048 }
  0x14   :  { %s37_s12 = sshll.u32 %s761_s11, 4  ;;  %p709_p8 = scmp.ne.s32.totalorder %s881_s4, %s708_s15  ;;  %s38_s12 = int_to_ptr.vmem [resolvable:$true] %s37_s12 }
  0x15   :  { %p712_p9 = scmp.lt.u32.totalorder %s708_s15, %s881_s4 }
  0x17   :  { %p714_p10 = pnand %p712_p9, %p709_p8 }
  0x19   :  { %717 = shalt.err (!%p714_p10)
}
  0x1a   :  { %s718_s20 = scalar_lea.vmem %s38_s12, 2048  ;;  %p723_p12 = scmp.lt.s32.totalorder %s38_s12, %s38_s12 }
  0x1b   :  { %p719_p11 = scmp.ne.s32.totalorder %s38_s12, %s718_s20  ;;  %p724_p13 = scmp.lt.s32.totalorder %s718_s20, %s718_s20 }
  0x1d   :  { %p725_p0 = por %p724_p13, %p723_p12 }
  0x1f   :  { %p726_p1 = pnand %p725_p0, %p719_p11 }
  0x21   :  { %729 = shalt.err (!%p726_p1)
}
  0x22   :  { %43 = dma.hbm_to_vmem [thread:$0]  %s881_s4, 2048, %s38_s12, [#allocation7], %s759_s7, %s759_s7, %s760_s8  }
  0x23   :  { %752 = dma.done.wait [#allocation4], 4096  }
  0x24   :  { %753 = vsyncadd [#allocation4], 4294963200 }
  0x25   :  { %754 = dma.done.wait [#allocation7], 2048  }
  0x26   :  { %755 = vsyncadd [#allocation7], 4294965248  ;;  %v762_v0 = vmov 0   ;;  %v52_v1 = vld [vmem:[%s877_s0] sm:$0xff]  ;;  %v294_v3 = vld [vmem:[#allocation3 + $0x88] sm:$0xff]  ;;  %s772_s27 = smov [#allocation8]  }
  0x27   :  { %677 = vset.pattern.permute.xlu0 %v762_v0  ;;  %v293_v2 = vld [vmem:[#allocation3 + $0x80] sm:$0xff]  ;;  %v278_v6 = vld [vmem:[#allocation3 + $0x8] sm:$0xff]  ;;  %v295_v7 = vld [vmem:[#allocation3 + $0x90] sm:$0xff]  ;;  %v763_v0 = vmov 2102212464   ;;  %s493_s28 = sshll.u32 %s772_s27, 4  ;;  %s494_s28 = int_to_ptr.vmem [resolvable:$true] %s493_s28 }
  0x28   :  { %56 = vperm.xlu0 %677, %v52_v1   ;;  %v277_v4 = vld [vmem:[#allocation3] sm:$0xff]  ;;  %v602_v5 = vpack.c.bf16 %v294_v3, %v293_v2  ;;  %v296_v8 = vld [vmem:[#allocation3 + $0x98] sm:$0xff]  ;;  %v279_v11 = vld [vmem:[#allocation3 + $0x10] sm:$0xff]  ;;  %v764_v2 = vmov 920167782   ;;  %p735_p3 = scmp.lt.s32.totalorder %s494_s28, %s494_s28 }
  0x29   :  { %v604_v9 = vpack.c.bf16 %v278_v6, %v277_v4  ;;  %v606_v10 = vpack.c.bf16 %v296_v8, %v295_v7  ;;  %v280_v12 = vld [vmem:[#allocation3 + $0x18] sm:$0xff]  ;;  %v297_v13 = vld [vmem:[#allocation3 + $0xa0] sm:$0xff]  ;;  %v298_v14 = vld [vmem:[#allocation3 + $0xa8] sm:$0xff]  ;;  %v765_v6 = vmov 1326507024  }
  0x2a   :  { %603 = vmatprep.subr.bf16.mxu0 %v602_v5  ;;  %v608_v15 = vpack.c.bf16 %v280_v12, %v279_v11  ;;  %v610_v16 = vpack.c.bf16 %v298_v14, %v297_v13  ;;  %v281_v17 = vld [vmem:[#allocation3 + $0x20] sm:$0xff]  ;;  %v282_v18 = vld [vmem:[#allocation3 + $0x28] sm:$0xff]  ;;  %v299_v19 = vld [vmem:[#allocation3 + $0xb0] sm:$0xff]  ;;  %v766_v8 = vmov 683565275  }
  0x2b   :  { %605 = vmatpush3.bf16.msra.mxu0 %v604_v9  ;;  %v300_v20 = vld [vmem:[#allocation3 + $0xb8] sm:$0xff]  ;;  %v612_v21 = vpack.c.bf16 %v282_v18, %v281_v17  ;;  %v283_v23 = vld [vmem:[#allocation3 + $0x30] sm:$0xff]  ;;  %v301_v25 = vld [vmem:[#allocation3 + $0xc0] sm:$0xff]  ;;  %v768_v13 = vmov 2131351028  }
  0x2c   :  { %607 = vmatprep.subr.bf16.mxu0 %v606_v10  ;;  %v614_v22 = vpack.c.bf16 %v300_v20, %v299_v19  ;;  %v284_v24 = vld [vmem:[#allocation3 + $0x38] sm:$0xff]  ;;  %v302_v26 = vld [vmem:[#allocation3 + $0xc8] sm:$0xff]  ;;  %v285_v29 = vld [vmem:[#allocation3 + $0x40] sm:$0xff]  ;;  %v767_v10 = vmov 2475754826  }
  0x2d   :  { %v616_v27 = vpack.c.bf16 %v284_v24, %v283_v23  ;;  %v618_v28 = vpack.c.bf16 %v302_v26, %v301_v25  ;;  %v286_v30 = vld [vmem:[#allocation3 + $0x48] sm:$0xff]  ;;  %v303_v31 = vld [vmem:[#allocation3 + $0xd0] sm:$0xff]  ;;  %v304_v32 = vld [vmem:[#allocation3 + $0xd8] sm:$0xff] }
  0x2e   :  { %v620_v33 = vpack.c.bf16 %v286_v30, %v285_v29  ;;  %v622_v34 = vpack.c.bf16 %v304_v32, %v303_v31  ;;  %v287_v35 = vld [vmem:[#allocation3 + $0x50] sm:$0xff]  ;;  %v288_v36 = vld [vmem:[#allocation3 + $0x58] sm:$0xff]  ;;  %v305_v37 = vld [vmem:[#allocation3 + $0xe0] sm:$0xff] }
  0x2f   :  { %609 = vmatpush3.bf16.msra.mxu0 %v608_v15  ;;  %v306_v38 = vld [vmem:[#allocation3 + $0xe8] sm:$0xff]  ;;  %v624_v39 = vpack.c.bf16 %v288_v36, %v287_v35  ;;  %v289_v41 = vld [vmem:[#allocation3 + $0x60] sm:$0xff]  ;;  %v307_v43 = vld [vmem:[#allocation3 + $0xf0] sm:$0xff] }
  0x30   :  { %611 = vmatprep.subr.bf16.mxu0 %v610_v16  ;;  %v626_v40 = vpack.c.bf16 %v306_v38, %v305_v37  ;;  %v290_v42 = vld [vmem:[#allocation3 + $0x68] sm:$0xff]  ;;  %v308_v44 = vld [vmem:[#allocation3 + $0xf8] sm:$0xff]  ;;  %v291_v47 = vld [vmem:[#allocation3 + $0x70] sm:$0xff] }
  0x31   :  { %v628_v45 = vpack.c.bf16 %v290_v42, %v289_v41  ;;  %v630_v46 = vpack.c.bf16 %v308_v44, %v307_v43  ;;  %v292_v48 = vld [vmem:[#allocation3 + $0x78] sm:$0xff]  ;;  %v503_v50 = vld [vmem:[%s878_s1] ss:$0 sm:$0xff] }
  0x32   :  { %v632_v49 = vpack.c.bf16 %v292_v48, %v291_v47 }
  0x33   :  { %613 = vmatpush3.bf16.msra.mxu0 %v612_v21 }
  0x34   :  { %615 = vmatprep.subr.bf16.mxu0 %v614_v22 }
  0x37   :  { %617 = vmatpush3.bf16.msra.mxu0 %v616_v27 }
  0x38   :  { %619 = vmatprep.subr.bf16.mxu0 %v618_v28 }
  0x3b   :  { %621 = vmatpush3.bf16.msra.mxu0 %v620_v33 }
  0x3c   :  { %623 = vmatprep.subr.bf16.mxu0 %v622_v34 }
  0x3f   :  { %625 = vmatpush3.bf16.msra.mxu0 %v624_v39 }
  0x40   :  { %627 = vmatprep.subr.bf16.mxu0 %v626_v40 }
  0x43   :  { %629 = vmatpush3.bf16.msra.mxu0 %v628_v45 }
  0x44   :  { %631 = vmatprep.subr.bf16.mxu0 %v630_v46 }
  0x47   :  { %633 = vmatpush3.bf16.msra.mxu0 %v632_v49 }
  0xa7   :  { %v57_v51 = vpop.permute.xlu0 %56 }
  0xa8   :  { %v838_v52 = vmul.f32 %v503_v50, %v57_v51 }
  0xaa   :  { %v69_v53 = vand.u32 2139095040, %v838_v52  ;;  %v66_v54 = vand.u32 2147483647, %v838_v52  ;;  %vm68_vm7 = vcmp.lt.s32.totalorder %v838_v52, 0  ;;  %vm158_vm15 = vweird.f32 %v838_v52 }
  0xac   :  { %v70_v55 = vshrl.u32 %v69_v53, 23  ;;  %v73_v57 = vand.u32 8388607, %v66_v54  ;;  %vm67_vm8 = vcmp.le.f32.partialorder %v66_v54, 0.7853982 }
  0xae   :  { %v504_v56 = vadd.s32 4294967169, %v70_v55  ;;  %v74_v60 = vor.u32 8388608, %v73_v57 }
  0xb0   :  { %v76_v58 = vadd.s32 1, %v504_v56  ;;  %v114_v4 = vshll.u32 %v74_v60, 8 }
  0xb2   :  { %vm77_vm0 = vcmp.gt.s32.totalorder %v76_v58, 0 }
  0xb3   :  { %v78_v59 = vsel %vm77_vm0, %v76_v58, 0  ;;  %vm770_vm0 = vmmov 0  }
  0xb4   :  { %v80_v61 = vand.u32 31, %v78_v59  ;;  %v79_v62 = vshrl.u32 %v78_v59, 5 }
  0xb6   :  { %v81_v63 = vsub.s32 32, %v80_v61  ;;  %v92_v1 = vshll.u32 %v763_v0, %v80_v61  ;;  %v95_v3 = vshll.u32 %v764_v2, %v80_v61  ;;  %v83_v9 = vshll.u32 %v766_v8, %v80_v61 }
  0xb7   :  { %v86_v12 = vshll.u32 %v767_v10, %v80_v61  ;;  %v89_v15 = vshll.u32 %v768_v13, %v80_v61  ;;  %vm101_vm1 = vcmp.lt.s32.totalorder %v79_v62, 4  ;;  %vm98_vm2 = vcmp.lt.s32.totalorder %v79_v62, 1 }
  0xb8   :  { %v93_v5 = vshrl.u32 %v764_v2, %v81_v63  ;;  %v96_v7 = vshrl.u32 %v765_v6, %v81_v63  ;;  %v84_v11 = vshrl.u32 %v767_v10, %v81_v63  ;;  %v87_v14 = vshrl.u32 %v768_v13, %v81_v63 }
  0xb9   :  { %v90_v16 = vshrl.u32 %v763_v0, %v81_v63  ;;  %v82_v20 = vshrl.u32 %v766_v8, %v81_v63  ;;  %vm99_vm3 = vcmp.lt.s32.totalorder %v79_v62, 2  ;;  %vm100_vm4 = vcmp.lt.s32.totalorder %v79_v62, 3 }
  0xba   :  { %v94_v17 = vor.u32 %v93_v5, %v92_v1  ;;  %v97_v18 = vor.u32 %v96_v7, %v95_v3  ;;  %v85_v19 = vor.u32 %v84_v11, %v83_v9  ;;  %v88_v21 = vor.u32 %v87_v14, %v86_v12 }
  0xbb   :  { %v91_v22 = vor.u32 %v90_v16, %v89_v15 }
  0xbc   :  { %v107_v23 = vsel %vm101_vm1, %v94_v17, 920167782  ;;  %v111_v24 = vsel %vm101_vm1, %v97_v18, 1326507024  ;;  %v106_v26 = vsel %vm98_vm2, %v85_v19, %v88_v21  ;;  %v102_v29 = vsel %vm98_vm2, %v82_v20, %v85_v19 }
  0xbd   :  { %v103_v25 = vsel %vm101_vm1, %v91_v22, 2102212464  ;;  %v108_v27 = vsel %vm100_vm4, %v91_v22, %v107_v23  ;;  %v110_v28 = vsel %vm98_vm2, %v88_v21, %v91_v22  ;;  %v112_v32 = vsel %vm100_vm4, %v94_v17, %v111_v24  ;;  %v393_v22 = vld [vmem:[#allocation6] sm:$0xff]  ;;  %v394_v23 = vld [vmem:[#allocation6 + $0x8] sm:$0xff] }
  0xbe   :  { %v104_v30 = vsel %vm100_vm4, %v88_v21, %v103_v25  ;;  %v109_v31 = vsel %vm99_vm3, %v106_v26, %v108_v27  ;;  %v113_v33 = vsel %vm99_vm3, %v110_v28, %v112_v32  ;;  %v635_v24 = vpack.c.bf16 %v394_v23, %v393_v22  ;;  %v395_v26 = vld [vmem:[#allocation6 + $0x10] sm:$0xff]  ;;  %v396_v27 = vld [vmem:[#allocation6 + $0x18] sm:$0xff] }
  0xbf   :  { %v844_v34 = vmul.u32.u64.low %v114_v4, %v109_v31  ;;  %v845_v35 = vmul.u32.u64.high %v114_v4, %v109_v31, %v844_v34  ;;  %v847_v36 = vmul.u32.u64.low %v114_v4, %v113_v33  ;;  %v848_v37 = vmul.u32.u64.high %v114_v4, %v113_v33, %v847_v36  ;;  %v399_v31 = vld [vmem:[#allocation6 + $0x30] sm:$0xff]  ;;  %v400_v32 = vld [vmem:[#allocation6 + $0x38] sm:$0xff] }
  0xc0   :  { %v105_v38 = vsel %vm99_vm3, %v102_v29, %v104_v30  ;;  %v769_v25 = vmov 0.0|0.0   ;;  %v638_v28 = vpack.c.bf16 %v396_v27, %v395_v26  ;;  %v397_v29 = vld [vmem:[#allocation6 + $0x20] sm:$0xff]  ;;  %v644_v33 = vpack.c.bf16 %v400_v32, %v399_v31 }
  0xc1   :  { %v124_v39 = vadd.s32 1, %v845_v35  ;;  %v121_v40 = vmul.u32 %v114_v4, %v105_v38  ;;  %vm123_vm5 = vc.u32 %v848_v37, %v844_v34  ;;  %v122_v53 = vadd.s32 %v844_v34, %v848_v37  ;;  %634 = vmatprep.subr.bf16.mxu1 %v769_v25  ;;  %v401_v34 = vld [vmem:[#allocation6 + $0x40] sm:$0xff]  ;;  %v403_v37 = vld [vmem:[#allocation6 + $0x50] sm:$0xff]  ;;  %v404_v38 = vld [vmem:[#allocation6 + $0x58] sm:$0xff] }
  0xc2   :  { %636 = vmatpush3.bf16.msra.mxu1 %v635_v24 }
  0xc3   :  { %v125_v41 = vsel %vm123_vm5, %v124_v39, %v845_v35  ;;  %637 = vmatprep.subr.bf16.mxu1 %v769_v25  ;;  %v402_v35 = vld [vmem:[#allocation6 + $0x48] sm:$0xff]  ;;  %v650_v39 = vpack.c.bf16 %v404_v38, %v403_v37 }
  0xc4   :  { %v126_v42 = vadd.s32 %v125_v41, %v121_v40  ;;  %v647_v36 = vpack.c.bf16 %v402_v35, %v401_v34  ;;  %v405_v40 = vld [vmem:[#allocation6 + $0x60] sm:$0xff]  ;;  %v406_v41 = vld [vmem:[#allocation6 + $0x68] sm:$0xff] }
  0xc6   :  { %v127_v43 = vadd.s32 536870912, %v126_v42  ;;  %639 = vmatpush3.bf16.msra.mxu1 %v638_v28 }
  0xc7   :  { %640 = vmatprep.subr.bf16.mxu1 %v769_v25 }
  0xc8   :  { %v128_v44 = vshrl.u32 %v127_v43, 30  ;;  %v653_v43 = vpack.c.bf16 %v406_v41, %v405_v40 }
  0xca   :  { %v129_v45 = vshll.u32 %v128_v44, 30  ;;  %v152_v2 = vsub.s32 4, %v128_v44 }
  0xcc   :  { %v130_v46 = vsub.s32 %v126_v42, %v129_v45  ;;  %v153_v5 = vsel %vm68_vm7, %v152_v2, %v128_v44  ;;  %v771_v42 = vmov 0.0   ;;  %v407_v44 = vld [vmem:[#allocation6 + $0x70] sm:$0xff]  ;;  %v408_v45 = vld [vmem:[#allocation6 + $0x78] sm:$0xff] }
  0xcd   :  { %v155_v7 = vsel %vm67_vm8, 0, %v153_v5  ;;  %599 = vmatprep.mubr.msk.f32.mxu1 %vm770_vm0, %v771_v42 }
  0xce   :  { %v132_v47 = vsub.s32 0, %v130_v46  ;;  %v263_v8 = vadd.s32 3, %v155_v7  ;;  %v159_v10 = vand.u32 3, %v155_v7 }
  0xd0   :  { %v505_v48 = vmin.u32 %v132_v47, %v130_v46  ;;  %v264_v9 = vand.u32 3, %v263_v8  ;;  %vm164_vm10 = vcmp.eq.s32.totalorder %v159_v10, 2  ;;  %vm161_vm12 = vcmp.eq.s32.totalorder %v159_v10, 0 }
  0xd1   :  { %vm160_vm14 = vcmp.lt.s32.totalorder %v159_v10, 2 }
  0xd2   :  { %v134_v49 = vclz %v505_v48  ;;  %vm269_vm9 = vcmp.eq.s32.totalorder %v264_v9, 2  ;;  %vm266_vm11 = vcmp.eq.s32.totalorder %v264_v9, 0  ;;  %vm265_vm13 = vcmp.lt.s32.totalorder %v264_v9, 2  ;;  %v512_v48 = vld [vmem:[%s880_s3] ss:$0 sm:$0xff]  ;;  %s730_s3 = scalar_lea.vmem %s494_s28, 128 }
  0xd3   :  { %p731_p2 = scmp.ne.s32.totalorder %s494_s28, %s730_s3  ;;  %p736_p4 = scmp.lt.s32.totalorder %s730_s3, %s730_s3 }
  0xd4   :  { %v506_v50 = vadd.s32 4294967294, %v134_v49 }
  0xd5   :  { %p737_p5 = por %p736_p4, %p735_p3 }
  0xd6   :  { %vm507_vm6 = vcmp.lt.s32.totalorder %v506_v50, 0 }
  0xd7   :  { %v137_v51 = vsel %vm507_vm6, 0, %v506_v50  ;;  %p738_p6 = pnand %p737_p5, %p731_p2 }
  0xd8   :  { %v138_v55 = vsub.s32 32, %v137_v51  ;;  %v142_v56 = vsub.s32 4294967266, %v137_v51  ;;  %v139_v57 = vshll.u32 %v130_v46, %v137_v51  ;;  %v656_v46 = vpack.c.bf16 %v408_v45, %v407_v44 }
  0xda   :  { %v140_v58 = vshrl.u32 %v122_v53, %v138_v55  ;;  %v143_v59 = vadd.s32 127, %v142_v56 }
  0xdc   :  { %v141_v60 = vor.u32 %v140_v58, %v139_v57  ;;  %v144_v61 = vshll.u32 %v143_v59, 23  ;;  %v514_v59 = vld [vmem:[%s882_s5] ss:$0 sm:$0xff] }
  0xde   :  { %v145_v62 = vor.u32 4788187, %v144_v61  ;;  %v148_v0 = vcvt.s32.f32 %v141_v60 }
  0xe0   :  { %v146_v63 = vand.u32 2147483647, %v145_v62 }
  0xe2   :  { %v149_v1 = vmul.f32 %v148_v0, %v146_v63 }
  0xe4   :  { %v150_v3 = vxor.u32 2147483648, %v149_v1 }
  0xe6   :  { %v151_v4 = vsel %vm68_vm7, %v150_v3, %v149_v1 }
  0xe7   :  { %v154_v6 = vsel %vm67_vm8, %v838_v52, %v151_v4  ;;  %v398_v52 = vld [vmem:[#allocation6 + $0x28] sm:$0xff] }
  0xe8   :  { %678 = vcosq.f32 %v154_v6  ;;  %v641_v30 = vpack.c.bf16 %v398_v52, %v397_v29 }
  0xe9   :  { %680 = vsinq.f32 %v154_v6 }
  0xea   :  { %642 = vmatpush3.bf16.msra.mxu1 %v641_v30 }
  0xeb   :  { %643 = vmatprep.subr.bf16.mxu1 %v769_v25 }
  0xee   :  { %645 = vmatpush3.bf16.msra.mxu1 %v644_v33 }
  0xef   :  { %646 = vmatprep.subr.bf16.mxu1 %v769_v25 }
  0xf2   :  { %v679_v11 = vpop.eup %678  ;;  %648 = vmatpush3.bf16.msra.mxu1 %v647_v36 }
  0xf3   :  { %v681_v12 = vpop.eup %680  ;;  %v165_v13 = vxor.u32 2147483648, %v679_v11  ;;  %649 = vmatprep.subr.bf16.mxu1 %v769_v25 }
  0xf4   :  { %v162_v14 = vxor.u32 2147483648, %v681_v12 }
  0xf5   :  { %v271_v15 = vsel %vm269_vm9, %v165_v13, %v681_v12  ;;  %v166_v54 = vsel %vm164_vm10, %v165_v13, %v681_v12 }
  0xf6   :  { %v268_v16 = vsel %vm266_vm11, %v679_v11, %v162_v14  ;;  %v163_v17 = vsel %vm161_vm12, %v679_v11, %v162_v14  ;;  %651 = vmatpush3.bf16.msra.mxu1 %v650_v39 }
  0xf7   :  { %v272_v18 = vsel %vm265_vm13, %v268_v16, %v271_v15  ;;  %v167_v19 = vsel %vm160_vm14, %v163_v17, %v166_v54  ;;  %652 = vmatprep.subr.bf16.mxu1 %v769_v25 }
  0xf8   :  { %v273_v20 = vsel %vm158_vm15, nan, %v272_v18  ;;  %v168_v21 = vsel %vm158_vm15, nan, %v167_v19 }
  0xf9   :  { %380 = vmatprep.mubr.f32.mxu0 %v273_v20 }
  0xfa   :  { %381 = vmatmul.mubr.f32.vlgmr.msra.gmra.mrb[0].mxu0 %v168_v21  ;;  %654 = vmatpush3.bf16.msra.mxu1 %v653_v43 }
  0xfb   :  { %655 = vmatprep.subr.bf16.mxu1 %v769_v25 }
  0xfe   :  { %657 = vmatpush3.bf16.msra.mxu1 %v656_v46 }
 0x1cd   :  { %v547_v47 = vpop.f32.mrb[0].mxu0 }
 0x1ce   :  { %v548_v49 = vpop.f32.mrb[1].mxu0 }
 0x1cf   :  { %v549_v50 = vadd.f32 %v548_v49, %v547_v47 }
 0x1d1   :  { %v383_v51 = vadd.f32 %v549_v50, %v512_v48 }
 0x1d3   :  { %v513_v53 = vmul.f32 -1.442695, %v383_v51 }
 0x1d5   :  { %682 = vpow2.f32 %v513_v53 }
 0x1df   :  { %v683_v55 = vpop.eup %682 }
 0x1e0   :  { %v389_v56 = vadd.f32 1.0, %v683_v55 }
 0x1e2   :  { %684 = vrcp.f32 %v389_v56 }
 0x1ec   :  { %v685_v57 = vpop.eup %684 }
 0x1ed   :  { %v392_v58 = vmul.f32 %v685_v57, %v383_v51 }
 0x1ef   :  { %600 = vmatmul.mubr.f32.vlgmr.msra.gmra.mrb[0].mxu1 %v392_v58 }
 0x2c2   :  { %v482_v60 = vpop.f32.mrb[0].mxu1 }
 0x2c3   :  { %v483_v61 = vadd.f32 %v514_v59, %v482_v60  ;;  %v601_v62 = vpop.f32.mrb[1].mxu1 }
 0x2c5   :  { %486 = vst [vmem:[#allocation8] sm:$0xff] %v483_v61 }
 0x2c6   :  { %741 = shalt.err (!%p738_p6)
}
 0x2c7   :  { %s742_s7 = scalar_lea.hbm %s883_s6, 128 }
 0x2c8   :  { %p743_p7 = scmp.ne.s32.totalorder %s883_s6, %s742_s7  ;;  %p746_p8 = scmp.lt.u32.totalorder %s742_s7, %s883_s6 }
 0x2ca   :  { %p748_p9 = pnand %p746_p8, %p743_p7 }
 0x2cc   :  { %751 = shalt.err (!%p748_p9)
}
 0x2cd   :  { %496 = dma.vmem_to_hbm [thread:$0]  %s494_s28, 128, %s883_s6, [#allocation5]  }
 0x2ce   :  { %756 = dma.done.wait [#allocation5], 128  }
 0x2cf   :  { %757 = vsyncadd [#allocation5], 4294967168 }
 0x2d0   :  { %500 = vsyncpa [#allocation4], 1 }
 0x2d1   :  { %501 = vsyncpa [#allocation7], 1 }
 0x2d2   :  { %502 = vsyncpa [#allocation5], 1 }

</bundles_post_ra>
